<compile_context>
chip_gen: v6e
topology: v6e:2x2x1
jax: 0.10.0
libtpu: 0.0.40
codegen_flags: <defaults>
</compile_context>

<pallas_src>
import jax
import jax.numpy as jnp
from jax import lax
from jax.experimental import pallas as pl
from jax.experimental.pallas import tpu as pltpu

# Deterministic Sobel taps (same values the module builds in __init__).
KX = ((-1.0, 0.0, 1.0),
      (-2.0, 0.0, 2.0),
      (-1.0, 0.0, 1.0))
KY = (( 1.0,  2.0,  1.0),
      ( 0.0,  0.0,  0.0),
      (-1.0, -2.0, -1.0))


def _sobel_kernel(x_ref, top_ref, bot_ref, o_ref):
    # x_ref  : (1, C, TH, W)  rows [h*TH, (h+1)*TH) of one image
    # top_ref: (1, C, 8, W)   8-row chunk whose LAST row is the row just above the tile
    # bot_ref: (1, C, 8, W)   8-row chunk whose FIRST row is the row just below the tile
    # o_ref  : (1, 1, TH, W)
    h = pl.program_id(1)
    n_h = pl.num_programs(1)
    TH, W = o_ref.shape[2], o_ref.shape[3]

    # The (1,3,3,3) Sobel weights are identical across input channels, so the
    # multi-channel conv == 3x3 conv of the channel sum.  Sum in-kernel (cheap
    # VPU adds, no extra HBM traffic).  Arithmetic in f32 even for bf16 inputs.
    s = jnp.sum(x_ref[0].astype(jnp.float32), axis=0)                     # (TH, W)

    # Halo rows (row above / below this tile).  Zero them at the image border
    # with a scalar multiply (reproduces conv2d's padding=1 zeros without a
    # vector select and without any host-side jnp.pad).
    top_valid = (h != 0).astype(jnp.float32)
    bot_valid = (h != n_h - 1).astype(jnp.float32)
    top_row = jnp.sum(top_ref[0, :, 7:8, :].astype(jnp.float32), axis=0) * top_valid  # (1, W)
    bot_row = jnp.sum(bot_ref[0, :, 0:1, :].astype(jnp.float32), axis=0) * bot_valid  # (1, W)

    # Border masks — built exactly once and reused (JAX does not CSE
    # broadcast_in_dim, so rebuilding them per use pays full-tile VPU ops).
    row = lax.broadcasted_iota(jnp.int32, (TH, W), 0)
    lane = lax.broadcasted_iota(jnp.int32, (TH, W), 1)
    is_first_row = row == 0
    is_last_row = row == TH - 1
    is_first_lane = lane == 0
    is_last_lane = lane == W - 1

    # Vertical neighbours via XLU sublane rolls (non-negative shifts only; a
    # shift of TH-1 is the circular equivalent of -1).  The wrapped row is
    # replaced by the halo row (or zero at the image border).
    above = jnp.where(is_first_row, top_row, pltpu.roll(s, 1, axis=0))       # s[i-1]
    below = jnp.where(is_last_row, bot_row, pltpu.roll(s, TH - 1, axis=0))   # s[i+1]

    # Separable Sobel:
    #   gx = horizontal [-1,0,1] of vertical [1,2,1] smoothing
    #   gy = horizontal [ 1,2,1] of vertical [1,0,-1] difference
    v_sum = above + 2.0 * s + below
    v_diff = above - below

    def left(v):   # v[:, j-1], zero at j == 0   (XLU lane roll + shared mask)
        return jnp.where(is_first_lane, 0.0, pltpu.roll(v, 1, axis=1))

    def right(v):  # v[:, j+1], zero at j == W-1 (shift W-1 == circular -1)
        return jnp.where(is_last_lane, 0.0, pltpu.roll(v, W - 1, axis=1))

    gx = right(v_sum) - left(v_sum)
    gy = left(v_diff) + 2.0 * v_diff + right(v_diff)

    o_ref[...] = (jnp.abs(gx) + jnp.abs(gy)).astype(o_ref.dtype)[None, None]


def _vmem_plan():
    """(vmem_limit_bytes, tile_budget_bytes) derived from physical VMEM."""
    phys = 64 << 20  # conservative default (v7x per-TC VMEM)
    try:
        info = pltpu.get_tpu_info()
        cap = getattr(info, "vmem_capacity_bytes", None)
        if cap:
            phys = int(cap)
    except Exception:
        pass
    # ~54 MiB on the 64 MiB (v7x) parts, capped at 100 MiB on the 128 MiB parts.
    vmem_limit = min(int(phys * 0.85), 100 << 20)
    # Leave headroom for compiler scratch / DMA descriptors.
    budget = max(vmem_limit - (6 << 20), 4 << 20)
    return vmem_limit, budget


def _tile_vmem_bytes(C, th, W, itemsize):
    # Real per-step footprint: double-buffered main + 2 halo input blocks,
    # double-buffered output block, ~8 live (TH, W) f32 temporaries
    # (s, above, below, v_sum, v_diff, gx, gy, masks).
    in_main = C * th * W * itemsize
    in_halo = 2 * C * 8 * W * itemsize
    out_blk = th * W * itemsize
    temps = 8 * th * W * 4
    return 2 * (in_main + in_halo) + 2 * out_blk + temps


def _choose_tile_h(N, C, H, W, itemsize, budget_bytes):
    # Largest TH that divides H, is a multiple of 8, and keeps the full per-step
    # VMEM footprint under `budget_bytes`.
    best = 8
    for th in range(8, H + 1, 8):
        if H % th == 0 and _tile_vmem_bytes(C, th, W, itemsize) <= budget_bytes:
            best = th
    # Guarantee >= 2 grid steps so both v7x TensorCores get work at N == 1
    # (both grid axes are "parallel"; a (1, 1) grid leaves one TC idle).
    if N * (H // best) < 2:
        for th in range(best - 8, 7, -8):
            if H % th == 0:
                best = th
                break
    return best
    # TODO(synk): if the budget ever forces TH < ~128 for huge C*W rows, switch
    # the input to memory_space=pl.ANY with a manual (1, C, TH+2, W) double-
    # buffered make_async_copy to cut the 16-row halo over-read to 2 rows.


def sobelxy(x, *, tile_h=None):
    """x: (N, C, H, W) float32/bfloat16 -> (N, 1, H, W), matching Sobelxy.forward."""
    N, C, H, W = x.shape
    orig_H, orig_W = H, W

    # Pad H to a multiple of 8 and W to a multiple of 128 with zeros.  Bottom /
    # right zero padding reproduces conv2d's zero border for the last real
    # row/column; the extra output rows/cols are sliced away.  Keeping the last
    # dim a multiple of 128 keeps the output stores lane-dense (no vst.msk).
    pad_h = (-H) % 8
    pad_w = (-W) % 128
    if pad_h or pad_w:
        x = jnp.pad(x, ((0, 0), (0, 0), (0, pad_h), (0, pad_w)))
        N, C, H, W = x.shape

    itemsize = jnp.dtype(x.dtype).itemsize
    vmem_limit, budget = _vmem_plan()
    if tile_h is None:
        tile_h = _choose_tile_h(N, C, H, W, itemsize, budget)
    assert tile_h % 8 == 0 and H % tile_h == 0

    th_blocks = tile_h // 8       # tile height in 8-row halo blocks
    h8_blocks = H // 8            # image height in 8-row halo blocks
    n_tiles = H // tile_h

    in_specs = [
        # Main tile.
        pl.BlockSpec((1, C, tile_h, W), lambda n, h: (n, 0, h, 0)),
        # 8-row chunk ending just above the tile (clamped at the top border;
        # its contribution is zeroed inside the kernel when h == 0).
        pl.BlockSpec((1, C, 8, W),
                     lambda n, h: (n, 0, jnp.maximum(h * th_blocks - 1, 0), 0)),
        # 8-row chunk starting just below the tile (clamped / zeroed at bottom).
        pl.BlockSpec((1, C, 8, W),
                     lambda n, h: (n, 0, jnp.minimum((h + 1) * th_blocks,
                                                     h8_blocks - 1), 0)),
    ]
    out_specs = pl.BlockSpec((1, 1, tile_h, W), lambda n, h: (n, 0, h, 0))

    out = pl.pallas_call(
        _sobel_kernel,
        out_shape=jax.ShapeDtypeStruct((N, 1, H, W), x.dtype),
        grid=(N, n_tiles),
        in_specs=in_specs,
        out_specs=out_specs,
        compiler_params=pltpu.CompilerParams(
            # Both axes independent -> megacore can split them (v7x 2 TCs).
            dimension_semantics=("parallel", "parallel"),
            vmem_limit_bytes=vmem_limit,
        ),
    )(x, x, x)

    if pad_h or pad_w:
        out = out[:, :, :orig_H, :orig_W]
    return out


def _reference(x):
    # Pure-JAX reference using the explicit (1, 3, 3, 3) weights from __init__.
    kx2d = jnp.asarray(KX, jnp.float32)
    ky2d = jnp.asarray(KY, jnp.float32)
    wx = jnp.broadcast_to(kx2d, (1, 3, 3, 3))  # (O, I, kH, kW)
    wy = jnp.broadcast_to(ky2d, (1, 3, 3, 3))
    dn = lax.conv_dimension_numbers(x.shape, wx.shape, ("NCHW", "OIHW", "NCHW"))
    cx = lax.conv_general_dilated(x.astype(jnp.float32), wx, (1, 1), ((1, 1), (1, 1)),
                                  dimension_numbers=dn)
    cy = lax.conv_general_dilated(x.astype(jnp.float32), wy, (1, 1), ((1, 1), (1, 1)),
                                  dimension_numbers=dn)
    return jnp.abs(cx) + jnp.abs(cy)


if __name__ == "__main__":
    key = jax.random.PRNGKey(0)
    k1, k2 = jax.random.split(key)

    # 3 input channels (the module's weights are (1, 3, 3, 3)); W = 128 keeps the
    # lane dimension a full vreg so the output store is lane-dense.
    x = jax.random.normal(k1, (2, 3, 16, 128), dtype=jnp.float32)
    ref = _reference(x)

    out = jax.block_until_ready(sobelxy(x))                   # auto tile (TH = 16)
    assert out.shape == (2, 1, 16, 128)
    assert jnp.allclose(out, ref, atol=1e-4, rtol=1e-4)

    out_tiled = jax.block_until_ready(sobelxy(x, tile_h=8))   # 2 row-tiles: halo path
    assert jnp.allclose(out_tiled, ref, atol=1e-4, rtol=1e-4)

    # Ragged shape: H=12, W=40 gets padded to (16, 128) internally, sliced back.
    x2 = jax.random.normal(k2, (1, 3, 12, 40), dtype=jnp.float32)
    out2 = jax.block_until_ready(sobelxy(x2))
    assert out2.shape == (1, 1, 12, 40)
    assert jnp.allclose(out2, _reference(x2), atol=1e-4, rtol=1e-4)

    print("KERNEL_OK")
</pallas_src>

<mosaic_0001>
module attributes {stable_mosaic.version = 11 : i64} {
  func.func @_sobel_kernel(%arg0: i32, %arg1: i32, %arg2: memref<1x3x16x128xf32, #tpu.memory_space<vmem>>, %arg3: memref<1x3x8x128xf32, #tpu.memory_space<vmem>>, %arg4: memref<1x3x8x128xf32, #tpu.memory_space<vmem>>, %arg5: memref<1x1x16x128xf32, #tpu.memory_space<vmem>>) attributes {dimension_semantics = [#tpu.dimension_semantics<parallel>, #tpu.dimension_semantics<parallel>], iteration_bounds = array<i64: 2, 1>, scalar_prefetch = 0 : i64, scratch_operands = 0 : i64, tpu.core_type = #tpu.core_type<tc>, window_params = [{transform_indices = @transform_0, window_bounds = array<i64: 1, 3, 16, 128>}, {transform_indices = @transform_1, window_bounds = array<i64: 1, 3, 8, 128>}, {transform_indices = @transform_2, window_bounds = array<i64: 1, 3, 8, 128>}, {transform_indices = @transform_3, window_bounds = array<i64: 1, 1, 16, 128>}]} {
    %c0 = arith.constant 0 : index
    %c0_0 = arith.constant 0 : index
    %c0_1 = arith.constant 0 : index
    %c0_2 = arith.constant 0 : index
    %0 = vector.load %arg2[%c0, %c0_0, %c0_1, %c0_2] : memref<1x3x16x128xf32, #tpu.memory_space<vmem>>, vector<1x3x16x128xf32>
    %1 = vector.shape_cast %0 : vector<1x3x16x128xf32> to vector<3x16x128xf32>
    %cst = arith.constant dense<0.000000e+00> : vector<16x128xf32>
    %2 = vector.multi_reduction <add>, %1, %cst [0] : vector<3x16x128xf32> to vector<16x128xf32>
    %c0_i32 = arith.constant 0 : i32
    %3 = arith.cmpi ne, %arg1, %c0_i32 : i32
    %4 = arith.extui %3 : i1 to i32
    %5 = arith.sitofp %4 : i32 to f32
    %c0_i32_3 = arith.constant 0 : i32
    %6 = arith.cmpi ne, %arg1, %c0_i32_3 : i32
    %7 = arith.extui %6 : i1 to i32
    %8 = arith.sitofp %7 : i32 to f32
    %c0_4 = arith.constant 0 : index
    %c0_5 = arith.constant 0 : index
    %c7 = arith.constant 7 : index
    %c0_6 = arith.constant 0 : index
    %9 = vector.load %arg3[%c0_4, %c0_5, %c7, %c0_6] : memref<1x3x8x128xf32, #tpu.memory_space<vmem>>, vector<1x3x1x128xf32>
    %10 = vector.shape_cast %9 : vector<1x3x1x128xf32> to vector<3x1x128xf32>
    %cst_7 = arith.constant dense<0.000000e+00> : vector<1x128xf32>
    %11 = vector.multi_reduction <add>, %10, %cst_7 [0] : vector<3x1x128xf32> to vector<1x128xf32>
    %12 = vector.broadcast %5 : f32 to vector<1x128xf32>
    %13 = arith.mulf %11, %12 : vector<1x128xf32>
    %c0_8 = arith.constant 0 : index
    %c0_9 = arith.constant 0 : index
    %c0_10 = arith.constant 0 : index
    %c0_11 = arith.constant 0 : index
    %14 = vector.load %arg4[%c0_8, %c0_9, %c0_10, %c0_11] : memref<1x3x8x128xf32, #tpu.memory_space<vmem>>, vector<1x3x1x128xf32>
    %15 = vector.shape_cast %14 : vector<1x3x1x128xf32> to vector<3x1x128xf32>
    %cst_12 = arith.constant dense<0.000000e+00> : vector<1x128xf32>
    %16 = vector.multi_reduction <add>, %15, %cst_12 [0] : vector<3x1x128xf32> to vector<1x128xf32>
    %17 = vector.broadcast %8 : f32 to vector<1x128xf32>
    %18 = arith.mulf %16, %17 : vector<1x128xf32>
    %19 = tpu.iota {dimensions = array<i32: 0>} : vector<16x128xi32>
    %20 = tpu.iota {dimensions = array<i32: 1>} : vector<16x128xi32>
    %c0_i32_13 = arith.constant 0 : i32
    %21 = vector.broadcast %c0_i32_13 : i32 to vector<16x128xi32>
    %22 = arith.cmpi eq, %19, %21 : vector<16x128xi32>
    %c15_i32 = arith.constant 15 : i32
    %23 = vector.broadcast %c15_i32 : i32 to vector<16x128xi32>
    %24 = arith.cmpi eq, %19, %23 : vector<16x128xi32>
    %c0_i32_14 = arith.constant 0 : i32
    %25 = vector.broadcast %c0_i32_14 : i32 to vector<16x128xi32>
    %26 = arith.cmpi eq, %20, %25 : vector<16x128xi32>
    %c127_i32 = arith.constant 127 : i32
    %27 = vector.broadcast %c127_i32 : i32 to vector<16x128xi32>
    %28 = arith.cmpi eq, %20, %27 : vector<16x128xi32>
    %c1_i32 = arith.constant 1 : i32
    %29 = tpu.dynamic_rotate %2 by %c1_i32 dim 0 : vector<16x128xf32>, i32 -> vector<16x128xf32>
    %30 = vector.shape_cast %13 : vector<1x128xf32> to vector<1x128xf32>
    %31 = vector.broadcast %30 : vector<1x128xf32> to vector<16x128xf32>
    %32 = arith.select %22, %31, %29 : vector<16x128xi1>, vector<16x128xf32>
    %c15_i32_15 = arith.constant 15 : i32
    %33 = tpu.dynamic_rotate %2 by %c15_i32_15 dim 0 : vector<16x128xf32>, i32 -> vector<16x128xf32>
    %34 = vector.shape_cast %18 : vector<1x128xf32> to vector<1x128xf32>
    %35 = vector.broadcast %34 : vector<1x128xf32> to vector<16x128xf32>
    %36 = arith.select %24, %35, %33 : vector<16x128xi1>, vector<16x128xf32>
    %cst_16 = arith.constant 2.000000e+00 : f32
    %37 = vector.broadcast %cst_16 : f32 to vector<16x128xf32>
    %38 = arith.mulf %37, %2 : vector<16x128xf32>
    %39 = arith.addf %32, %38 : vector<16x128xf32>
    %40 = arith.addf %39, %36 : vector<16x128xf32>
    %41 = arith.subf %32, %36 : vector<16x128xf32>
    %c127_i32_17 = arith.constant 127 : i32
    %42 = tpu.dynamic_rotate %40 by %c127_i32_17 dim 1 : vector<16x128xf32>, i32 -> vector<16x128xf32>
    %cst_18 = arith.constant 0.000000e+00 : f32
    %43 = vector.broadcast %cst_18 : f32 to vector<16x128xf32>
    %44 = arith.select %28, %43, %42 : vector<16x128xi1>, vector<16x128xf32>
    %c1_i32_19 = arith.constant 1 : i32
    %45 = tpu.dynamic_rotate %40 by %c1_i32_19 dim 1 : vector<16x128xf32>, i32 -> vector<16x128xf32>
    %cst_20 = arith.constant 0.000000e+00 : f32
    %46 = vector.broadcast %cst_20 : f32 to vector<16x128xf32>
    %47 = arith.select %26, %46, %45 : vector<16x128xi1>, vector<16x128xf32>
    %48 = arith.subf %44, %47 : vector<16x128xf32>
    %c1_i32_21 = arith.constant 1 : i32
    %49 = tpu.dynamic_rotate %41 by %c1_i32_21 dim 1 : vector<16x128xf32>, i32 -> vector<16x128xf32>
    %cst_22 = arith.constant 0.000000e+00 : f32
    %50 = vector.broadcast %cst_22 : f32 to vector<16x128xf32>
    %51 = arith.select %26, %50, %49 : vector<16x128xi1>, vector<16x128xf32>
    %cst_23 = arith.constant 2.000000e+00 : f32
    %52 = vector.broadcast %cst_23 : f32 to vector<16x128xf32>
    %53 = arith.mulf %52, %41 : vector<16x128xf32>
    %54 = arith.addf %51, %53 : vector<16x128xf32>
    %c127_i32_24 = arith.constant 127 : i32
    %55 = tpu.dynamic_rotate %41 by %c127_i32_24 dim 1 : vector<16x128xf32>, i32 -> vector<16x128xf32>
    %cst_25 = arith.constant 0.000000e+00 : f32
    %56 = vector.broadcast %cst_25 : f32 to vector<16x128xf32>
    %57 = arith.select %28, %56, %55 : vector<16x128xi1>, vector<16x128xf32>
    %58 = arith.addf %54, %57 : vector<16x128xf32>
    %59 = math.absf %48 : vector<16x128xf32>
    %60 = math.absf %58 : vector<16x128xf32>
    %61 = arith.addf %59, %60 : vector<16x128xf32>
    %62 = vector.shape_cast %61 : vector<16x128xf32> to vector<1x1x16x128xf32>
    %c0_26 = arith.constant 0 : index
    %c0_27 = arith.constant 0 : index
    %c0_28 = arith.constant 0 : index
    %c0_29 = arith.constant 0 : index
    %63 = vector.load %arg5[%c0_26, %c0_27, %c0_28, %c0_29] : memref<1x1x16x128xf32, #tpu.memory_space<vmem>>, vector<1x1x16x128xf32>
    tpu.vector_store %arg5[%c0_26, %c0_27, %c0_28, %c0_29], %62 {strides = array<i32>} : memref<1x1x16x128xf32, #tpu.memory_space<vmem>>, vector<1x1x16x128xf32>,
    return
  }
  func.func @transform_0(%arg0: i32, %arg1: i32) -> (i32, i32, i32, i32) {
    %c0_i32 = arith.constant 0 : i32
    %c0_i32_0 = arith.constant 0 : i32
    %c0_i32_1 = arith.constant 0 : i32
    return %arg0, %c0_i32, %arg1, %c0_i32_0 : i32, i32, i32, i32
  }
  func.func @transform_1(%arg0: i32, %arg1: i32) -> (i32, i32, i32, i32) {
    %c2_i32 = arith.constant 2 : i32
    %0 = arith.muli %arg1, %c2_i32 : i32
    %c1_i32 = arith.constant 1 : i32
    %1 = arith.subi %0, %c1_i32 : i32
    %c0_i32 = arith.constant 0 : i32
    %2 = arith.maxsi %1, %c0_i32 : i32
    %c0_i32_0 = arith.constant 0 : i32
    %c0_i32_1 = arith.constant 0 : i32
    %c0_i32_2 = arith.constant 0 : i32
    return %arg0, %c0_i32_0, %2, %c0_i32_1 : i32, i32, i32, i32
  }
  func.func @transform_2(%arg0: i32, %arg1: i32) -> (i32, i32, i32, i32) {
    %c1_i32 = arith.constant 1 : i32
    %0 = arith.addi %arg1, %c1_i32 : i32
    %c2_i32 = arith.constant 2 : i32
    %1 = arith.muli %0, %c2_i32 : i32
    %c1_i32_0 = arith.constant 1 : i32
    %2 = arith.minsi %1, %c1_i32_0 : i32
    %c0_i32 = arith.constant 0 : i32
    %c0_i32_1 = arith.constant 0 : i32
    %c0_i32_2 = arith.constant 0 : i32
    return %arg0, %c0_i32, %2, %c0_i32_1 : i32, i32, i32, i32
  }
  func.func @transform_3(%arg0: i32, %arg1: i32) -> (i32, i32, i32, i32) {
    %c0_i32 = arith.constant 0 : i32
    %c0_i32_0 = arith.constant 0 : i32
    %c0_i32_1 = arith.constant 0 : i32
    return %arg0, %c0_i32, %arg1, %c0_i32_0 : i32, i32, i32, i32
  }
}

</mosaic_0001>

<bundles_post_ra>
// kernel: tpu_custom_call.1
= control target key start
LH: loop header
LB: loop body
LE: loop exit
PB: predicated region body
PF: predicated region fallthrough
CT: control target
= control target key end

     0   :  { %s1125_s0 = inlined_call_operand.hbm [shape: f32[2,3,16,128], index: 0, kind: input, shape index: {}]   ;;  %s1126_s1 = inlined_call_operand.hbm [shape: f32[2,3,16,128], index: 1, kind: input, shape index: {}]   ;;  %s1127_s2 = inlined_call_operand.hbm [shape: f32[2,3,16,128], index: 2, kind: input, shape index: {}]   ;;  %s1128_s3 = inlined_call_operand.hbm [shape: f32[2,1,16,128], index: 3, kind: output, shape index: {}]  }
   0x1   :  { %1138 = sst [smem:[#allocation16_spill]] %s1126_s1 }
   0x2   :  { %8 = vsyncpa [#allocation3], 0 }
   0x3   :  { %10 = vsyncpa [#allocation3 + $0x1], 0 }
   0x4   :  { %11 = vsyncpa [#allocation6], 0 }
   0x5   :  { %13 = vsyncpa [#allocation6 + $0x1], 0 }
   0x6   :  { %14 = vsyncpa [#allocation4], 0 }
   0x7   :  { %16 = vsyncpa [#allocation4 + $0x1], 0  ;;  %s894_s12 = smov 0   ;;  %s896_s13 = smov 0  }
   0x8   :  { %s898_s14 = smov 0   ;;  %s900_s15 = smov 0  }
   0x9   :  { %s902_s16 = smov 0   ;;  %s904_s17 = smov 0  }
   0xa LB: > { %1139 = sst [smem:[#allocation12_spill]] %s849_s14  ;;  %s925_s18 = sadd.s32 4294967295, %s861_s17   ;;  %s861_s17 = sphi %s904_s17, %s22_s17   ;;  %s857_s16 = sphi %s902_s16, %s1158_s16   ;;  %s853_s15 = sphi %s900_s15, %s1157_s15   ;;  %s849_s14 = sphi %s898_s14, %s1156_s14   ;;  %s845_s13 = sphi %s896_s13, %s1160_s13   ;;  %s841_s12 = sphi %s894_s12, %s1159_s12  }
   0xb   : > { %1140 = sst [smem:[#allocation13_spill]] %s857_s16  ;;  %s589_s19 = sadd.s32 4294967294, %s861_s17  }
   0xc   : > { %s34_s20 = sadd.s32 1, %s857_s16  ;;  %s43_s21 = sadd.s32 1, %s849_s14 }
   0xd   : > { %p36_p0 = scmp.ge.s32.totalorder %s34_s20, 2  ;;  %p50_p1 = scmp.ne.s32.totalorder %s849_s14, %s845_s13 }
   0xe   : > { %p51_p2 = scmp.eq.s32.totalorder %s861_s17, 0  ;;  %p56_p3 = scmp.ne.s32.totalorder %s845_s13, %s841_s12 }
   0xf   : > { %s1162_s20 = smov (%p36_p0, %s34_s20), 0  ;;  %p57_p5 = scmp.eq.s32.totalorder %s925_s18, 0 }
  0x10   : > { %1141 = sst [smem:[#allocation14_spill]] %s1162_s20  ;;  %p937_p4 = por %p51_p2, %p50_p1 }
  0x11   : > { %s38_s23 = ssub.s32 %s857_s16, %s1162_s20  ;;  %p154_p6 = scmp.eq.s32.totalorder %s925_s18, 1 }
  0x12   : > { %p41_p7 = scmp.eq.s32.totalorder %s38_s23, 0  ;;  %p945_p8 = por %p57_p5, %p56_p3 }
  0x13   : > { %p949_p9 = por %p154_p6, %p50_p1  ;;  %p160_p10 = scmp.eq.s32.totalorder %s589_s19, 1 }
  0x14   : > { %s954_s26 = scalar_select %p41_p7, %s849_s14, %s43_s21  }
  0x15   : > { %p956_p11 = por %p160_p10, %p56_p3  ;;  %p635_p13 = scmp.lt.s32.totalorder %s861_s17, 2 }
  0x16   : > { %1145 = sst [smem:[#allocation15_spill]] %s954_s26  ;;  %s963_s28 = sand.u32 1, %s849_s14  }
  0x17   : > { %s966_s29 = smul.u32 768, %s857_s16  ;;  %p970_p0 = pnand %p635_p13, %p937_p4 }
  0x18   : > { %s203_s4 = sand.u32 1, %s861_s17   ;;  %s1129_s5 = smul.u32 24, %s963_s28 }
  0x19   : > { %s1148_s1 = sld [smem:[#allocation16_spill]]  ;;  %s982_s11 = scalar_lea.sflag [#allocation6], %s203_s4 }
  0x1a   : > { %s207_s9 = scalar_lea.vmem [#allocation5], %s1129_s5  ;;  %p695_p1 = pneg %p970_p0 }
  0x1b   : > { %s219_s10 = sshll.u32 %s207_s9, 4  ;;  %s863_s21 = smov [#allocation5]   ;;  %s220_s10 = int_to_ptr.vmem [resolvable:$true] %s219_s10 }
  0x1c   : > { %s706_s19 = scalar_lea.vmem %s220_s10, 384  ;;  %s711_s22 = sshll.u32 %s863_s21, 4  ;;  %s712_s22 = int_to_ptr.vmem [resolvable:$false] %s711_s22 }
  0x1d   : > { %p707_p2 = scmp.ne.s32.totalorder %s220_s10, %s706_s19  ;;  %s713_s23 = scalar_lea.vmem %s712_s22, 768 }
  0x1e   : > { %p714_p5 = scmp.lt.s32.totalorder %s220_s10, %s712_s22  ;;  %p715_p6 = scmp.lt.s32.totalorder %s713_s23, %s706_s19 }
  0x1f   : > { %s218_s8 = scalar_lea.hbm %s1148_s1, %s966_s29  ;;  %p709_p3 = pnand %p707_p2, %p695_p1 }
  0x20   : > { %p716_p7 = por %p715_p6, %p714_p5 }
  0x21   : > { %p710_p4 = pneg %p709_p3 }
  0x23   : > { %p717_p10 = pnand %p716_p7, %p710_p4 }
  0x25   : > { %720 = shalt.err (!%p717_p10)
}
  0x26   : > { %s1132_s6 = smov 256   ;;  %s1133_s4 = smov 128  }
  0x27   : > { %s1135_s7 = smov 8   ;;  %p595_p13 = scmp.ge.s32.totalorder %s861_s17, 1 }
  0x28   : > { %627 = dma.hbm_to_vmem [thread:$0]  (!%p970_p0), %s218_s8, 384, %s220_s10, %s982_s11, %s1132_s6, %s1133_s4, %s1135_s7  }
  0x29   : > { %p253_p2 = scmp.lt.s32.totalorder %s861_s17, 3  ;;  %s605_s19 = smul.u32 48, %s963_s28 }
  0x2a   : > { %s192_s23 = scalar_lea.hbm %s1125_s0, %s966_s29  ;;  %s603_s5 = sadd.s32 128, %s966_s29 }
  0x2b   : > { %p997_p3 = pnand %p595_p13, %p253_p2  ;;  %s1010_s16 = scalar_lea.hbm %s1127_s2, %s603_s5 }
  0x2c   : > { %s184_s26 = scalar_lea.vmem [#allocation2], %s605_s19  ;;  %s1150_s10 = smul.u32 24, %s963_s28 }
  0x2d   : > { %s193_s8 = sshll.u32 %s184_s26, 4  ;;  %s181_s7 = scalar_lea.sflag [#allocation3], %s963_s28  ;;  %s194_s8 = int_to_ptr.vmem [resolvable:$true] %s193_s8 }
  0x2e   : > { %s233_s6 = scalar_lea.vmem [#allocation7], %s1150_s10  ;;  %s734_s14 = scalar_lea.vmem %s194_s8, 768 }
  0x2f   : > { %s245_s4 = sshll.u32 %s233_s6, 4  ;;  %p735_p4 = scmp.ne.s32.totalorder %s194_s8, %s734_s14  ;;  %s1014_s4 = int_to_ptr.vmem [resolvable:$true] %s245_s4 }
  0x30   : > { %s867_s29 = smov [#allocation2]  }
  0x31   : > { %p737_p5 = pnand %p735_p4, %p695_p1  ;;  %s739_s21 = sshll.u32 %s867_s29, 4  ;;  %s740_s21 = int_to_ptr.vmem [resolvable:$false] %s739_s21 }
  0x32   : > { %s741_s1 = scalar_lea.vmem %s740_s21, 1536  ;;  %p742_p7 = scmp.lt.s32.totalorder %s194_s8, %s740_s21 }
  0x33   : > { %p738_p6 = pneg %p737_p5  ;;  %p743_p10 = scmp.lt.s32.totalorder %s741_s1, %s734_s14 }
  0x35   : > { %p744_p13 = por %p743_p10, %p742_p7 }
  0x37   : > { %p745_p2 = pnand %p744_p13, %p738_p6 }
  0x39   : > { %748 = shalt.err (!%p745_p2)
}
  0x3a   : > { %s1151_s20 = smov 8   ;;  %s1152_s26 = smov 128  }
  0x3b   : > { %624 = dma.hbm_to_vmem [thread:$0]  (!%p970_p0), %s192_s23, 768, %s194_s8, %s181_s7, %s1152_s26, %s1152_s26, %s1151_s20  }
  0x3c   : > { %s762_s28 = scalar_lea.vmem %s1014_s4, 384  ;;  %s868_s14 = smov [#allocation7]  }
  0x3d   : > { %p763_p4 = scmp.ne.s32.totalorder %s1014_s4, %s762_s28  ;;  %s767_s5 = sshll.u32 %s868_s14, 4  ;;  %s768_s5 = int_to_ptr.vmem [resolvable:$false] %s767_s5 }
  0x3e   : > { %s769_s6 = scalar_lea.vmem %s768_s5, 768  ;;  %p770_p6 = scmp.lt.s32.totalorder %s1014_s4, %s768_s5 }
  0x3f   : > { %p765_p5 = pnand %p763_p4, %p695_p1  ;;  %p771_p7 = scmp.lt.s32.totalorder %s769_s6, %s762_s28 }
  0x41   : > { %p766_p12 = pneg %p765_p5  ;;  %p772_p10 = por %p771_p7, %p770_p6 }
  0x43   : > { %p773_p13 = pnand %p772_p10, %p766_p12 }
  0x45   : > { %776 = shalt.err (!%p773_p13)
}
  0x46   : > { %s1153_s7 = smov 256   ;;  %257 = sbr.rel (%p997_p3) target bundleno = 246 (0xf6), region = 32 }
  0x47   : > { %630 = dma.hbm_to_vmem [thread:$0]  (!%p970_p0), %s1010_s16, 384, %s1014_s4, %s982_s11, %s1153_s7, %s1152_s26, %s1151_s20  }
  0x48   : > { %s1042_s19 = sand.u32 (!%p997_p3), 1, %s845_s13  }
  0x49   : > { %s611_s22 = smul.u32 (!%p997_p3), 48, %s1042_s19  ;;  %s260_s23 = scalar_lea.sflag (!%p997_p3), [#allocation3], %s1042_s19 }
  0x4b   : > { %s263_s8 = scalar_lea.vmem [#allocation2], %s611_s22 }
  0x4c   : > { %828 = dma.done.wait (%p945_p8), %s260_s23, 768  }
  0x4d   : > { %830 = vsyncadd (%p945_p8), %s260_s23, 4294966528  ;;  %s268_s16 = sand.u32 1, %s925_s18   ;;  %s612_s30 = smul.u32 24, %s1042_s19 }
  0x4e   : > { %s269_s11 = scalar_lea.sflag [#allocation6], %s268_s16 }
  0x4f   : > { %s272_s4 = scalar_lea.vmem [#allocation5], %s612_s30 }
  0x50   : > { %832 = dma.done.wait (%p945_p8), %s269_s11, 768  }
  0x51   : > { %834 = vsyncadd (%p945_p8), %s269_s11, 4294966528  ;;  %v357_v0 = vlaneseq  ;;  %v324_v2 = vld [vmem:[%s263_s8] sm:$0xff]  ;;  %v325_v3 = vld [vmem:[%s263_s8 + $0x8] sm:$0xff]  ;;  %vm340_vm0 = vcmask 1040384   ;;  %s281_s18 = scalar_lea.vmem [#allocation7], %s612_s30  ;;  %s869_s24 = smov 1  }
  0x52   : > { %v326_v4 = vld [vmem:[%s263_s8 + $0x10] sm:$0xff]  ;;  %v327_v5 = vld [vmem:[%s263_s8 + $0x18] sm:$0xff]  ;;  %v328_v6 = vld [vmem:[%s263_s8 + $0x20] sm:$0xff]  ;;  %s870_s9 = smov 127   ;;  %s596_s10 = sshll.u32 %s1042_s19, 4 }
  0x53   : > { %v358_v1 = vshrl.u32 %v357_v0, 7  ;;  %v329_v7 = vld [vmem:[%s263_s8 + $0x28] sm:$0xff]  ;;  %v330_v8 = vadd.f32 %v326_v4, %v324_v2  ;;  %v332_v9 = vadd.f32 %v327_v5, %v325_v3  ;;  %v339_v12 = vld [vmem:[%s272_s4 + $0x17] sm:$0x1]  ;;  %v348_v17 = vld [vmem:[%s281_s18] sm:$0x1] }
  0x54   : > { %v337_v10 = vld [vmem:[%s272_s4 + $0x7] sm:$0x1]  ;;  %v338_v11 = vld [vmem:[%s272_s4 + $0xf] sm:$0x1]  ;;  %v344_v16 = vsel %vm340_vm0, %v339_v12, 0.0  ;;  %v351_v23 = vsel %vm340_vm0, %v348_v17, 0.0 }
  0x55   : > { %vm370_vm1 = vcmp.lt.s32.totalorder %v358_v1, 1  ;;  %v331_v13 = vadd.f32 %v330_v8, %v328_v6  ;;  %v341_v14 = vsel %vm340_vm0, %v337_v10, 0.0  ;;  %v342_v15 = vsel %vm340_vm0, %v338_v11, 0.0  ;;  %v349_v21 = vld [vmem:[%s281_s18 + $0x8] sm:$0x1]  ;;  %s313_s29 = scalar_lea.vmem [#allocation8], %s596_s10 }
  0x56   : > { %v333_v18 = vadd.f32 %v332_v9, %v329_v7  ;;  %v343_v19 = vadd.f32 %v342_v15, %v341_v14  ;;  %v375_v20 = vsub.s32 0, %v358_v1  ;;  %v350_v22 = vld [vmem:[%s281_s18 + $0x10] sm:$0x1]  ;;  %v352_v26 = vsel %vm340_vm0, %v349_v21, 0.0  ;;  %s454_s21 = sshll.u32 %s313_s29, 4  ;;  %s604_s1 = sshll.u32 %s853_s15, 8  ;;  %s1072_s21 = int_to_ptr.vmem [resolvable:$true] %s454_s21 }
  0x57   : > { %v368_v24 = vrot.slane %v331_v13, 7  ;;  %v379_v25 = vrot.slane %v331_v13, 1  ;;  %v354_v27 = vsel %vm340_vm0, %v350_v22, 0.0  ;;  %v353_v31 = vadd.f32 %v352_v26, %v351_v23  ;;  %s1077_s28 = scalar_lea.hbm %s1128_s3, %s604_s1  ;;  %s439_s14 = scalar_lea.sflag [#allocation4], %s1042_s19 }
  0x58   : > { %v345_v28 = vadd.f32 %v344_v16, %v343_v19  ;;  %v369_v29 = vrot.slane %v333_v18, 7  ;;  %v380_v30 = vrot.slane %v333_v18, 1  ;;  %vm381_vm2 = vcmp.lt.s32.totalorder %v358_v1, 7  ;;  %s777_s5 = scalar_lea.vmem %s1072_s21, 256  ;;  %s871_s15 = smov [#allocation8]  }
  0x59   : > { %v359_v32 = vadd.s32 8, %v358_v1  ;;  %v391_v33 = vmul.f32 2.0, %v333_v18  ;;  %v355_v35 = vadd.f32 %v354_v27, %v353_v31  ;;  %vm362_vm3 = vcmp.eq.s32.totalorder %v358_v1, 0  ;;  %p778_p8 = scmp.ne.s32.totalorder %s1072_s21, %s777_s5  ;;  %s781_s6 = sshll.u32 %s871_s15, 4  ;;  %s782_s6 = int_to_ptr.vmem [resolvable:$false] %s781_s6 }
  0x5a   : > { %v347_v34 = vmul.f32 0.0, %v345_v28  ;;  %v372_v36 = vsel %vm370_vm1, %v369_v29, %v368_v24  ;;  %v371_v37 = vsel %vm370_vm1, %v368_v24, %v369_v29  ;;  %v382_v39 = vsel %vm381_vm2, %v379_v25, %v380_v30  ;;  %s783_s7 = scalar_lea.vmem %s782_s6, 512  ;;  %p784_p1 = scmp.lt.s32.totalorder %s1072_s21, %s782_s6 }
  0x5b   : > { %v356_v40 = vmul.f32 0.0, %v355_v35  ;;  %vm365_vm4 = vcmp.eq.s32.totalorder %v359_v32, 15  ;;  %v383_v41 = vsel %vm381_vm2, %v380_v30, %v379_v25  ;;  %v393_v42 = vadd.f32 %v391_v33, %v371_v37  ;;  %p779_p12 = pnand %p778_p8, %p949_p9  ;;  %p785_p3 = scmp.lt.s32.totalorder %s783_s7, %s777_s5 }
  0x5c   : > { %v376_v38 = vrot.slane %v347_v34, %v375_v20  ;;  %v390_v43 = vmul.f32 2.0, %v331_v13  ;;  %v361_v52 = vand.u32 127, %v357_v0 }
  0x5d   : > { %v387_v45 = vrot.slane %v356_v40, %v375_v20  ;;  %p780_p0 = pneg %p779_p12  ;;  %p786_p2 = por %p785_p3, %p784_p1 }
  0x5e   : > { %v377_v44 = vsel %vm362_vm3, %v376_v38, %v372_v36  ;;  %vm366_vm5 = vcmp.eq.s32.totalorder %v361_v52, 0  ;;  %vm367_vm6 = vcmp.eq.s32.totalorder %v361_v52, 127 }
  0x5f   : > { %v396_v46 = vsub.f32 %v377_v44, %v382_v39  ;;  %v389_v47 = vsel %vm365_vm4, %v387_v45, %v383_v41  ;;  %v392_v50 = vadd.f32 %v390_v43, %v377_v44  ;;  %p787_p4 = pnand %p786_p2, %p780_p0 }
  0x60   : > { %v395_v48 = vadd.f32 %v393_v42, %v389_v47  ;;  %v397_v49 = vsub.f32 %v371_v37, %v389_v47 }
  0x61   : > { %412 = vrot.lane.b32.xlu0 %v396_v46, %s869_s24  ;;  %v394_v51 = vadd.f32 %v392_v50, %v382_v39  ;;  %v418_v53 = vmul.f32 2.0, %v396_v46 }
  0x62   : > { %400 = vrot.lane.b32.xlu1 %v395_v48, %s870_s9  ;;  %v419_v58 = vmul.f32 2.0, %v397_v49 }
  0x65   : > { %414 = vrot.lane.b32.xlu0 %v397_v49, %s869_s24 }
  0x66   : > { %406 = vrot.lane.b32.xlu1 %v395_v48, %s869_s24 }
  0x69   : > { %404 = vrot.lane.b32.xlu0 %v394_v51, %s869_s24 }
  0x6a   : > { %398 = vrot.lane.b32.xlu1 %v394_v51, %s870_s9 }
  0x6d   : > { %422 = vrot.lane.b32.xlu0 %v396_v46, %s870_s9 }
  0x6e   : > { %424 = vrot.lane.b32.xlu1 %v397_v49, %s870_s9 }
  0xd3   : > { %v413_v54 = vpop.permute.xlu0 %412 }
  0xd4   : > { %v416_v55 = vsel %vm366_vm5, 0.0, %v413_v54  ;;  %v401_v57 = vpop.permute.xlu1 %400 }
  0xd5   : > { %v420_v56 = vadd.f32 %v418_v53, %v416_v55  ;;  %v403_v6 = vsel %vm367_vm6, 0.0, %v401_v57 }
  0xd7   : > { %v415_v59 = vpop.permute.xlu0 %414 }
  0xd8   : > { %v417_v60 = vsel %vm366_vm5, 0.0, %v415_v59  ;;  %v407_v62 = vpop.permute.xlu1 %406 }
  0xd9   : > { %v421_v61 = vadd.f32 %v419_v58, %v417_v60  ;;  %v409_v0 = vsel %vm366_vm5, 0.0, %v407_v62 }
  0xda   : > { %v411_v8 = vsub.f32 %v403_v6, %v409_v0 }
  0xdb   : > { %v405_v63 = vpop.permute.xlu0 %404 }
  0xdc   : > { %v408_v1 = vsel %vm366_vm5, 0.0, %v405_v63  ;;  %v399_v2 = vpop.permute.xlu1 %398  ;;  %v431_v15 = vand.u32 2147483647, %v411_v8 }
  0xdd   : > { %v402_v3 = vsel %vm367_vm6, 0.0, %v399_v2 }
  0xde   : > { %v410_v4 = vsub.f32 %v402_v3, %v408_v1 }
  0xdf   : > { %v423_v5 = vpop.permute.xlu0 %422 }
  0xe0   : > { %v426_v7 = vsel %vm367_vm6, 0.0, %v423_v5  ;;  %v425_v10 = vpop.permute.xlu1 %424  ;;  %v430_v12 = vand.u32 2147483647, %v410_v4 }
  0xe1   : > { %v428_v9 = vadd.f32 %v426_v7, %v420_v56  ;;  %v427_v11 = vsel %vm367_vm6, 0.0, %v425_v10 }
  0xe2   : > { %v429_v14 = vadd.f32 %v427_v11, %v421_v61 }
  0xe3   : > { %v432_v13 = vand.u32 2147483647, %v428_v9 }
  0xe4   : > { %v433_v17 = vand.u32 2147483647, %v429_v14 }
  0xe5   : > { %v434_v16 = vadd.f32 %v432_v13, %v430_v12 }
  0xe6   : > { %v435_v18 = vadd.f32 %v433_v17, %v431_v15 }
  0xe7   : > { %436 = vst [vmem:[%s313_s29] sm:$0xff] %v434_v16 }
  0xe8   : > { %437 = vst [vmem:[%s313_s29 + $0x8] sm:$0xff] %v435_v18 }
  0xe9   : > { %790 = shalt.err (!%p787_p4)
}
  0xea   : > { %s791_s22 = scalar_lea.hbm %s1077_s28, 256  ;;  %s795_s16 = scalar_lea.hbm %s1128_s3, 512 }
  0xeb   : > { %p792_p5 = scmp.ne.s32.totalorder %s1077_s28, %s791_s22  ;;  %p796_p10 = scmp.lt.s32.totalorder %s1077_s28, %s1128_s3 }
  0xec   : > { %p797_p13 = scmp.lt.s32.totalorder %s795_s16, %s791_s22 }
  0xed   : > { %p793_p6 = pnand %p792_p5, %p949_p9 }
  0xee   : > { %p798_p8 = por %p797_p13, %p796_p10 }
  0xef   : > { %p794_p7 = pneg %p793_p6 }
  0xf1   : > { %p799_p12 = pnand %p798_p8, %p794_p7 }
  0xf3   : > { %802 = shalt.err (!%p799_p12)
}
  0xf4   : > { %s872_s4 = smov 128   ;;  %s873_s18 = smov 8  }
  0xf5   : > { %619 = dma.vmem_to_hbm [thread:$0]  (%p949_p9), %s1072_s21, 256, %s1077_s28, %s439_s14, %s872_s4, %s872_s4, %s873_s18  }
  0xf6 PF: > { %s469_s24 = sand.u32 1, %s841_s12   ;;  %p1154_p0 = scmp.ge.s32.totalorder %s861_s17, 2 }
  0xf7   : > { %s470_s9 = scalar_lea.sflag [#allocation4], %s469_s24 }
  0xf8   : > { %p632_p1 = pnand %p1154_p0, %p956_p11 }
  0xfa   : > { %p633_p3 = pneg %p632_p1 }
  0xfc   : > { %836 = dma.done.wait (%p633_p3), %s470_s9, 256  }
  0xfd   : > { %838 = vsyncadd (%p633_p3), %s470_s9, 4294967040  ;;  %s22_s17 = sadd.s32 1, %s861_s17   ;;  %s1155_s10 = sld [smem:[#allocation12_spill]] }
  0xfe   : > { %p19_p2 = scmp.ge.s32.totalorder %s22_s17, 4   ;;  %s1156_s14 = sld [smem:[#allocation15_spill]] }
  0xff   : > { %s1157_s15 = sld [smem:[#allocation13_spill]]  ;;  %s1159_s12 = smov %s845_s13 }
 0x100   : > { %s1158_s16 = sld [smem:[#allocation14_spill]]  ;;  %21 = sbr.rel (!%p19_p2) target bundleno = 10 (0xa), region = 101 }
 0x103   : > { %s1160_s13 = smov %s1155_s10 }
 0x105   :  { %475 = vsyncpa [#allocation3], 1 }
 0x106   :  { %477 = vsyncpa [#allocation3 + $0x1], 1 }
 0x107   :  { %478 = vsyncpa [#allocation6], 1 }
 0x108   :  { %480 = vsyncpa [#allocation6 + $0x1], 1 }
 0x109   :  { %481 = vsyncpa [#allocation4], 1 }
 0x10a   :  { %483 = vsyncpa [#allocation4 + $0x1], 1 }

</bundles_post_ra>
